<compile_context>
chip_gen: v5e
topology: v5e:2x2
jax: 0.10.0
libtpu: 0.0.40
codegen_flags: <defaults>
</compile_context>

<pallas_src>
import functools

import jax
import jax.numpy as jnp
from jax.experimental import pallas as pl
from jax.experimental.pallas import tpu as pltpu

_MIB = 1 << 20
_VMEM_TILE_BUDGET = 36 * _MIB   # working-set budget used when shrinking tiles
_VMEM_LIMIT_BYTES = 48 * _MIB   # explicit scoped-VMEM limit (< v7x's 64 MiB physical)


def _patch_embed_kernel(x_ref, w_ref, b_ref, o_ref):
    # x_ref: (tm, Pp)  bf16 -- tm rows of flattened patches
    # w_ref: (Pp, td)  bf16 -- projection weight, K-major (native MXU orientation)
    # b_ref: (1,  td)  f32
    # o_ref: (tm, td)  out dtype
    acc = jnp.dot(x_ref[...], w_ref[...], preferred_element_type=jnp.float32)
    o_ref[...] = (acc + b_ref[...]).astype(o_ref.dtype)   # f32 bias add, cast at the store


def _round_up(n, m):
    return ((n + m - 1) // m) * m


def _vmem_bytes(tm, td, pp, out_bytes):
    # double-buffered x tile + weight tile + out tile (+ bias)
    return 2 * (tm * pp * 2) + 2 * (td * pp * 2) + 2 * (tm * td * out_bytes) + 2 * (td * 4)


def _pick_tiles(m, pp, dp, out_bytes):
    """Choose (tm, td).  td = whole Dp when the weight tile is small (x read once)."""
    td_opts = [dp] + [c for c in (2048, 1024, 512, 256, 128) if c < dp and dp % c == 0]
    ti = 0
    while ti + 1 < len(td_opts) and td_opts[ti] * pp * 2 > 8 * _MIB:
        ti += 1                                   # only split D if the weight tile is big
    td = td_opts[ti]

    if m <= 256:
        tm = _round_up(m, 8)                      # single tile for tiny M
    elif m <= 2048:
        tm = 256                                  # >= 2 parallel M steps for v7x megacore
    else:
        tm = 512                                  # large DMAs for mem-bound v6e/v7x

    # Shrink (tm first: it does not increase x HBM traffic) until the working set fits.
    while _vmem_bytes(tm, td, pp, out_bytes) > _VMEM_TILE_BUDGET:
        if tm > 8:
            tm = max(((tm // 2) // 8) * 8, 8)     # keep tm a multiple of 8 (sublane rule)
        elif ti + 1 < len(td_opts):
            ti += 1
            td = td_opts[ti]
        else:
            break
    return tm, td


@functools.partial(jax.jit, static_argnames=("patch_size", "out_dtype"))
def patch_embed_forward(x, weight, bias, *, patch_size, out_dtype=None):
    """x: (B, C, H, W). weight: (D, C, ph, pw). bias: (D,). Returns (B, N, D)."""
    B, C, H, W = x.shape
    D = weight.shape[0]
    ph = pw = patch_size
    assert H % ph == 0 and W % pw == 0
    gh, gw = H // ph, W // pw
    N = gh * gw
    P = C * ph * pw
    M = B * N
    out_dtype = x.dtype if out_dtype is None else out_dtype
    out_bytes = jnp.dtype(out_dtype).itemsize

    # Lane-align the output channels (D) and the contraction dim (P).
    Dp = _round_up(D, 128)
    Pp = _round_up(P, 128)
    tm, td = _pick_tiles(M, Pp, Dp, out_bytes)
    Mp = _round_up(M, tm)

    # --- glue: extract non-overlapping patches -> (M, P), bf16 cast fused into the pass ---
    xp = x.astype(jnp.bfloat16).reshape(B, C, gh, ph, gw, pw)
    xp = jnp.transpose(xp, (0, 2, 4, 1, 3, 5)).reshape(M, P)   # columns in (c, kh, kw) order
    if Mp != M or Pp != P:
        xp = jnp.pad(xp, ((0, Mp - M), (0, Pp - P)))           # zero rows/cols sliced off later

    # --- weight/bias prep: one-time transpose to K-major (P, D), zero-pad to (Pp, Dp) ---
    w2 = jnp.transpose(weight.reshape(D, P).astype(jnp.bfloat16))   # (P, D)
    b2 = bias.astype(jnp.float32).reshape(1, D)
    if Dp != D or Pp != P:
        w2 = jnp.pad(w2, ((0, Pp - P), (0, Dp - D)))
        b2 = jnp.pad(b2, ((0, 0), (0, Dp - D)))

    m_tiles, d_tiles = Mp // tm, Dp // td

    out = pl.pallas_call(
        _patch_embed_kernel,
        out_shape=jax.ShapeDtypeStruct((Mp, Dp), out_dtype),
        grid_spec=pltpu.PrefetchScalarGridSpec(
            num_scalar_prefetch=0,
            # D innermost: the x block index is constant across it -> xp read from HBM once.
            grid=(m_tiles, d_tiles),
            in_specs=[
                pl.BlockSpec((tm, Pp), lambda m, d: (m, 0)),   # patches
                pl.BlockSpec((Pp, td), lambda m, d: (0, d)),   # weight (K-major)
                pl.BlockSpec((1, td), lambda m, d: (0, d)),    # bias
            ],
            out_specs=pl.BlockSpec((tm, td), lambda m, d: (m, d)),
        ),
        compiler_params=pltpu.CompilerParams(
            dimension_semantics=("parallel", "parallel"),      # no reduction axis (K whole)
            vmem_limit_bytes=_VMEM_LIMIT_BYTES,
        ),
        cost_estimate=pl.CostEstimate(
            flops=2 * Mp * Pp * Dp,
            bytes_accessed=Mp * Pp * 2 + Pp * Dp * 2 + Mp * Dp * out_bytes + Dp * 4,
            transcendentals=0,
        ),
    )(xp, w2, b2)

    # norm_layer=None in the module -> nn.Identity(): nothing more to apply.
    return out[:M, :D].reshape(B, N, D)


def reference_patch_embed(x, weight, bias, *, patch_size):
    """Pure-JAX f32 reference equal to PyTorch Conv2d(k=s=patch) + flatten(2) + transpose(1,2)."""
    out = jax.lax.conv_general_dilated(
        x, weight,
        window_strides=(patch_size, patch_size),
        padding="VALID",
        dimension_numbers=("NCHW", "OIHW", "NCHW"),
    )                                                   # (B, D, gh, gw)
    out = out + bias[None, :, None, None]
    B, D, gh, gw = out.shape
    return jnp.transpose(out.reshape(B, D, gh * gw), (0, 2, 1))  # (B, N, D)


if __name__ == "__main__":
    key = jax.random.PRNGKey(0)
    kx, kw, kb = jax.random.split(key, 3)

    # 1) Small, module-consistent shapes: img=16, patch=4, in_c=4, embed_dim=32.
    B, C, H, W = 2, 4, 16, 16
    patch_size, embed_dim = 4, 32
    x = jax.random.normal(kx, (B, C, H, W), dtype=jnp.float32)
    weight = jax.random.normal(kw, (embed_dim, C, patch_size, patch_size), dtype=jnp.float32) * 0.02
    bias = jax.random.normal(kb, (embed_dim,), dtype=jnp.float32) * 0.02

    out = jax.block_until_ready(patch_embed_forward(x, weight, bias, patch_size=patch_size))
    ref = reference_patch_embed(x, weight, bias, patch_size=patch_size)
    assert out.shape == (B, (H // patch_size) * (W // patch_size), embed_dim)
    assert jnp.allclose(out, ref, atol=3e-2, rtol=3e-2), float(jnp.max(jnp.abs(out - ref)))

    # 2) Module default dims (img=96, patch=16, embed_dim=768), tiny batch: exercises the
    #    whole-weight-resident single-D-tile path with P = 1024 (already lane-aligned).
    B2, C2, H2, W2, ps2, D2 = 2, 4, 96, 96, 16, 768
    kx2, kw2, kb2 = jax.random.split(jax.random.PRNGKey(1), 3)
    x2 = jax.random.normal(kx2, (B2, C2, H2, W2), dtype=jnp.float32)
    wt2 = jax.random.normal(kw2, (D2, C2, ps2, ps2), dtype=jnp.float32) * 0.02
    bs2 = jax.random.normal(kb2, (D2,), dtype=jnp.float32) * 0.02
    out2 = jax.block_until_ready(patch_embed_forward(x2, wt2, bs2, patch_size=ps2))
    ref2 = reference_patch_embed(x2, wt2, bs2, patch_size=ps2)
    assert out2.shape == (B2, (H2 // ps2) * (W2 // ps2), D2)
    assert jnp.allclose(out2, ref2, atol=3e-2, rtol=3e-2), float(jnp.max(jnp.abs(out2 - ref2)))

    # 3) Odd shapes: exercises M padding (M=98 -> 104), P padding (48 -> 128), D padding
    #    (64 -> 128) all at once, still at small scale.
    B3, C3, H3, W3, ps3, D3 = 2, 3, 28, 28, 4, 64
    kx3, kw3, kb3 = jax.random.split(jax.random.PRNGKey(2), 3)
    x3 = jax.random.normal(kx3, (B3, C3, H3, W3), dtype=jnp.float32)
    wt3 = jax.random.normal(kw3, (D3, C3, ps3, ps3), dtype=jnp.float32) * 0.02
    bs3 = jax.random.normal(kb3, (D3,), dtype=jnp.float32) * 0.02
    out3 = jax.block_until_ready(patch_embed_forward(x3, wt3, bs3, patch_size=ps3))
    ref3 = reference_patch_embed(x3, wt3, bs3, patch_size=ps3)
    assert out3.shape == (B3, (H3 // ps3) * (W3 // ps3), D3)
    assert jnp.allclose(out3, ref3, atol=3e-2, rtol=3e-2), float(jnp.max(jnp.abs(out3 - ref3)))

    print("KERNEL_OK")
</pallas_src>

<mosaic_0001>
module attributes {stable_mosaic.version = 11 : i64} {
  func.func @_patch_embed_kernel(%arg0: i32, %arg1: i32, %arg2: memref<32x128xbf16, #tpu.memory_space<vmem>>, %arg3: memref<128x128xbf16, #tpu.memory_space<vmem>>, %arg4: memref<1x128xf32, #tpu.memory_space<vmem>>, %arg5: memref<32x128xf32, #tpu.memory_space<vmem>>) attributes {dimension_semantics = [#tpu.dimension_semantics<parallel>, #tpu.dimension_semantics<parallel>], iteration_bounds = array<i64: 1, 1>, scalar_prefetch = 0 : i64, scratch_operands = 0 : i64, tpu.core_type = #tpu.core_type<tc>, window_params = [{transform_indices = @transform_0, window_bounds = array<i64: 32, 128>}, {transform_indices = @transform_1, window_bounds = array<i64: 128, 128>}, {transform_indices = @transform_2, window_bounds = array<i64: 1, 128>}, {transform_indices = @transform_3, window_bounds = array<i64: 32, 128>}]} {
    %c0 = arith.constant 0 : index
    %c0_0 = arith.constant 0 : index
    %0 = vector.load %arg2[%c0, %c0_0] : memref<32x128xbf16, #tpu.memory_space<vmem>>, vector<32x128xbf16>
    %c0_1 = arith.constant 0 : index
    %c0_2 = arith.constant 0 : index
    %1 = vector.load %arg3[%c0_1, %c0_2] : memref<128x128xbf16, #tpu.memory_space<vmem>>, vector<128x128xbf16>
    %cst = arith.constant dense<0.000000e+00> : vector<32x128xf32>
    %2 = tpu.matmul %0, %1, %cst {dimension_numbers = #tpu.dot_dimension_numbers<[1], [0], [0], [1], [0, 0, 1, 1], [], []>} : vector<32x128xbf16>, vector<128x128xbf16>, vector<32x128xf32> -> vector<32x128xf32>
    %c0_3 = arith.constant 0 : index
    %c0_4 = arith.constant 0 : index
    %3 = vector.load %arg4[%c0_3, %c0_4] : memref<1x128xf32, #tpu.memory_space<vmem>>, vector<1x128xf32>
    %4 = vector.broadcast %3 : vector<1x128xf32> to vector<32x128xf32>
    %5 = arith.addf %2, %4 : vector<32x128xf32>
    %c0_5 = arith.constant 0 : index
    %c0_6 = arith.constant 0 : index
    %6 = vector.load %arg5[%c0_5, %c0_6] : memref<32x128xf32, #tpu.memory_space<vmem>>, vector<32x128xf32>
    tpu.vector_store %arg5[%c0_5, %c0_6], %5 {strides = array<i32>} : memref<32x128xf32, #tpu.memory_space<vmem>>, vector<32x128xf32>,
    return
  }
  func.func @transform_0(%arg0: i32, %arg1: i32) -> (i32, i32) {
    %c0_i32 = arith.constant 0 : i32
    %c0_i32_0 = arith.constant 0 : i32
    return %arg0, %c0_i32 : i32, i32
  }
  func.func @transform_1(%arg0: i32, %arg1: i32) -> (i32, i32) {
    %c0_i32 = arith.constant 0 : i32
    %c0_i32_0 = arith.constant 0 : i32
    return %c0_i32, %arg1 : i32, i32
  }
  func.func @transform_2(%arg0: i32, %arg1: i32) -> (i32, i32) {
    %c0_i32 = arith.constant 0 : i32
    %c0_i32_0 = arith.constant 0 : i32
    return %c0_i32, %arg1 : i32, i32
  }
  func.func @transform_3(%arg0: i32, %arg1: i32) -> (i32, i32) {
    %c0_i32 = arith.constant 0 : i32
    return %arg0, %arg1 : i32, i32
  }
}

</mosaic_0001>

<bundles_post_ra>
// kernel: patch_embed_forward.1
= control target key start
LH: loop header
LB: loop body
LE: loop exit
PB: predicated region body
PF: predicated region fallthrough
CT: control target
= control target key end

     0   :  { %s287_s0 = inlined_call_operand.vmem [shape: bf16[32,128], index: 0, kind: input, shape index: {}]   ;;  %s288_s1 = inlined_call_operand.vmem [shape: bf16[128,128], index: 1, kind: input, shape index: {}]   ;;  %s289_s2 = inlined_call_operand.vmem [shape: f32[1,128], index: 2, kind: input, shape index: {}]   ;;  %s290_s3 = inlined_call_operand.hbm [shape: f32[32,128], index: 3, kind: output, shape index: {}]  }
   0x1   :  { %v189_v0 = vld [vmem:[%s288_s1 + $0x38] sm:$0xff]  ;;  %v188_v1 = vld [vmem:[%s288_s1 + $0x30] sm:$0xff] }
   0x2   :  { %99 = vmatpush.bf16.msra.mxu0 %v189_v0  ;;  %190 = vmatpush.bf16.msra.mxu1 %v189_v0 }
   0x3   :  { %8 = vsyncpa [#allocation3], 0  ;;  %v187_v2 = vld [vmem:[%s288_s1 + $0x28] sm:$0xff]  ;;  %v186_v3 = vld [vmem:[%s288_s1 + $0x20] sm:$0xff]  ;;  %s230_s10 = smov 8  }
   0x4   :  { %v185_v4 = vld [vmem:[%s288_s1 + $0x18] sm:$0xff]  ;;  %v184_v5 = vld [vmem:[%s288_s1 + $0x10] sm:$0xff]  ;;  %v183_v6 = vld [vmem:[%s288_s1 + $0x8] sm:$0xff] }
   0x5   :  { %v182_v7 = vld [vmem:[%s288_s1] sm:$0xff]  ;;  %v181_v9 = vld [vmem:[%s287_s0 + $0x8] sm:$0xff]  ;;  %s228_s1 = smov [#allocation2]  }
   0x6   :  { %100 = vmatpush.bf16.msra.mxu0 %v188_v1  ;;  %191 = vmatpush.bf16.msra.mxu1 %v188_v1  ;;  %v180_v8 = vld [vmem:[%s287_s0] sm:$0xff]  ;;  %s126_s7 = sshll.u32 %s228_s1, 4  ;;  %s128_s0 = sshll.u32 %s290_s3, 4  ;;  %s127_s7 = int_to_ptr.vmem [resolvable:$true] %s126_s7  ;;  %s129_s0 = int_to_ptr.hbm [resolvable:$true] %s128_s0 }
   0x7   :  { %v201_v10 = vld [vmem:[%s289_s2] ss:$0 sm:$0xff]  ;;  %s229_s2 = smov 128  }
   0xa   :  { %101 = vmatpush.bf16.msra.mxu0 %v187_v2  ;;  %192 = vmatpush.bf16.msra.mxu1 %v187_v2 }
   0xe   :  { %102 = vmatpush.bf16.msra.mxu0 %v186_v3  ;;  %193 = vmatpush.bf16.msra.mxu1 %v186_v3 }
  0x12   :  { %103 = vmatpush.bf16.msra.mxu0 %v185_v4  ;;  %194 = vmatpush.bf16.msra.mxu1 %v185_v4 }
  0x16   :  { %104 = vmatpush.bf16.msra.mxu0 %v184_v5  ;;  %195 = vmatpush.bf16.msra.mxu1 %v184_v5 }
  0x1a   :  { %105 = vmatpush.bf16.msra.mxu0 %v183_v6  ;;  %196 = vmatpush.bf16.msra.mxu1 %v183_v6 }
  0x1e   :  { %106 = vmatpush.bf16.msra.mxu0 %v182_v7  ;;  %197 = vmatpush.bf16.msra.mxu1 %v182_v7 }
  0x21   :  { %107 = vmatmul.bf16.vlgmr.msra.gmra.mxu0 %v180_v8  ;;  %112 = vmatmul.bf16.vlgmr.msra.gmra.mxu1 %v181_v9 }
  0x9e   :  { %v108_v11 = vpop.f32.mrf.mxu0  ;;  %v113_v12 = vpop.f32.mrf.mxu1 }
  0x9f   :  { %v109_v13 = vadd.f32 %v201_v10, %v108_v11  ;;  %v114_v14 = vadd.f32 %v201_v10, %v113_v12 }
  0xa1   :  { %118 = vst [vmem:[#allocation2] sm:$0xff] %v109_v13 }
  0xa2   :  { %120 = vst [vmem:[#allocation2 + $0x10] sm:$0xff] %v114_v14 }
  0xa6   :  { %v110_v15 = vpop.f32.mrf.mxu0  ;;  %v115_v16 = vpop.f32.mrf.mxu1 }
  0xa7   :  { %v111_v17 = vadd.f32 %v201_v10, %v110_v15  ;;  %v116_v18 = vadd.f32 %v201_v10, %v115_v16 }
  0xa9   :  { %119 = vst [vmem:[#allocation2 + $0x8] sm:$0xff] %v111_v17 }
  0xaa   :  { %121 = vst [vmem:[#allocation2 + $0x18] sm:$0xff] %v116_v18 }
  0xab   :  { %134 = dma.vmem_to_hbm [thread:$0]  %s127_s7, 512, %s129_s0, [#allocation3], %s229_s2, %s229_s2, %s230_s10  }
  0xac   :  { %226 = dma.done.wait [#allocation3], 512  }
  0xad   :  { %227 = vsyncadd [#allocation3], 4294966784 }
  0xae   :  { %139 = vsyncpa [#allocation3], 1 }

</bundles_post_ra>
